<compile_context>
chip_gen: v7x
topology: tpu7x:2x2x1
jax: 0.10.0
libtpu: 0.0.40
codegen_flags: <defaults>
</compile_context>

<pallas_src>
import functools

import jax
import jax.numpy as jnp
from jax.experimental import pallas as pl
from jax.experimental.pallas import tpu as pltpu


def _linear_kernel(x_ref, wt_ref, b_ref, o_ref):
    # x_ref : (TB, D_in)    batch tile
    # wt_ref: (D_in, D_out) pre-transposed weight, VMEM-resident (1 buffer)
    # b_ref : (1, D_out)    bias row, VMEM-resident (1 buffer)
    # o_ref : (TB, D_out)   output tile
    acc = jnp.dot(x_ref[...], wt_ref[...], preferred_element_type=jnp.float32)
    o_ref[...] = (acc + b_ref[...].astype(jnp.float32)).astype(o_ref.dtype)


def _choose_batch_tile(B, d_in, d_out, itemsize, *, max_tb, vmem_budget):
    """Pick the batch tile: big enough to amortize per-step overhead, small
    enough to fit the scoped-VMEM budget, and >=2 grid steps at large B."""
    tb = B if B <= max_tb else max_tb

    # Double-buffered x/out tiles + single-buffered weight/bias must fit.
    per_row = 2 * (d_in + d_out) * itemsize
    resident = (d_in * d_out + d_out) * itemsize
    cap = max((vmem_budget - resident) // per_row, 8)
    if tb > cap:
        tb = cap

    # Large batch in one step would leave a v7x TensorCore idle on the
    # "parallel" axis -> split into at least 2 steps.
    if B >= 2048 and pl.cdiv(B, tb) < 2:
        tb = (B // 2 // 8) * 8

    # Sublane alignment: multiple of 8 unless the tile equals the full dim.
    if tb != B:
        tb = max((tb // 8) * 8, 8)
    return int(tb)


@functools.partial(jax.jit, static_argnames=("block_b",))
def linear_forward_pallas(x, weight, bias, *, block_b=8192):
    """Pallas nn.Linear forward.

    x:      (B, D_in)
    weight: (D_out, D_in)   -- PyTorch convention
    bias:   (D_out,)
    returns (B, D_out)
    """
    B, d_in = x.shape
    d_out = weight.shape[0]

    # One-time transpose outside the grid loop (negligible cost, guarantees no
    # per-step weight transpose inside the kernel body).
    wt = weight.T                    # (D_in, D_out)
    b2 = bias.reshape(1, d_out)

    tb = _choose_batch_tile(B, d_in, d_out, x.dtype.itemsize,
                            max_tb=block_b, vmem_budget=12 * 1024 * 1024)
    grid = (pl.cdiv(B, tb),)

    out = pl.pallas_call(
        _linear_kernel,
        out_shape=jax.ShapeDtypeStruct((B, d_out), x.dtype),
        grid_spec=pltpu.PrefetchScalarGridSpec(
            num_scalar_prefetch=0,
            grid=grid,
            in_specs=[
                # x: tiled over the batch.
                pl.BlockSpec((tb, d_in), lambda i: (i, 0)),
                # weight / bias: grid-invariant -> DMA'd once, single-buffered.
                pl.BlockSpec((d_in, d_out), lambda i: (0, 0),
                             pipeline_mode=pl.Buffered(1)),
                pl.BlockSpec((1, d_out), lambda i: (0, 0),
                             pipeline_mode=pl.Buffered(1)),
            ],
            out_specs=pl.BlockSpec((tb, d_out), lambda i: (i, 0)),
        ),
        compiler_params=pltpu.CompilerParams(
            # Batch tiles are independent -> shard across TensorCores (v7x).
            dimension_semantics=("parallel",),
        ),
    )(x, wt, b2)
    return out


def linear_forward(x, weight, bias, *, block_b=8192):
    """Size-gated dispatch: tiny problems are pure dispatch/DMA overhead for a
    pallas_call, so plain XLA wins there; large batches use the Pallas path."""
    B, d_in = x.shape
    d_out = weight.shape[0]
    if B * d_in * d_out < (1 << 18):
        return x @ weight.T + bias
    return linear_forward_pallas(x, weight, bias, block_b=block_b)


if __name__ == "__main__":
    key = jax.random.PRNGKey(0)
    kx, kw, kb, kx2 = jax.random.split(key, 4)

    # Shapes implied by the module: nn.Linear(input_dim=32, output_dim=16), batch=8.
    B, D_in, D_out = 8, 32, 16
    bound = 1.0 / jnp.sqrt(jnp.float32(D_in))
    x = jax.random.normal(kx, (B, D_in), dtype=jnp.float32)
    weight = jax.random.uniform(kw, (D_out, D_in), jnp.float32, -bound, bound)
    bias = jax.random.uniform(kb, (D_out,), jnp.float32, -bound, bound)

    # 1) Run the Pallas kernel at the small demo shape.
    out = jax.block_until_ready(linear_forward_pallas(x, weight, bias))
    ref = x @ weight.T + bias
    assert out.shape == (B, D_out)
    assert jnp.allclose(out, ref, atol=1e-5, rtol=1e-5)

    # 2) Exercise the multi-step "parallel" grid + ragged last batch tile.
    B2 = 2056
    x2 = jax.random.normal(kx2, (B2, D_in), dtype=jnp.float32)
    out2 = jax.block_until_ready(linear_forward_pallas(x2, weight, bias, block_b=256))
    ref2 = x2 @ weight.T + bias
    assert out2.shape == (B2, D_out)
    assert jnp.allclose(out2, ref2, atol=1e-5, rtol=1e-5)

    # 3) Size-gated dispatcher (plain XLA at the tiny demo shape).
    out3 = jax.block_until_ready(linear_forward(x, weight, bias))
    assert jnp.allclose(out3, ref, atol=1e-5, rtol=1e-5)

    print("KERNEL_OK")
</pallas_src>

<mosaic_0001>
module attributes {stable_mosaic.version = 11 : i64} {
  func.func @_linear_kernel(%arg0: i32, %arg1: memref<8x32xf32, #tpu.memory_space<vmem>>, %arg2: memref<32x16xf32, #tpu.memory_space<vmem>>, %arg3: memref<1x16xf32, #tpu.memory_space<vmem>>, %arg4: memref<8x16xf32, #tpu.memory_space<vmem>>) attributes {dimension_semantics = [#tpu.dimension_semantics<parallel>], iteration_bounds = array<i64: 1>, scalar_prefetch = 0 : i64, scratch_operands = 0 : i64, tpu.core_type = #tpu.core_type<tc>, window_params = [{transform_indices = @transform_0, window_bounds = array<i64: 8, 32>}, {pipeline_mode = #tpu.pipeline_mode<synchronous>, transform_indices = @transform_1, window_bounds = array<i64: 32, 16>}, {pipeline_mode = #tpu.pipeline_mode<synchronous>, transform_indices = @transform_2, window_bounds = array<i64: 1, 16>}, {transform_indices = @transform_3, window_bounds = array<i64: 8, 16>}]} {
    %c0 = arith.constant 0 : index
    %c0_0 = arith.constant 0 : index
    %0 = vector.load %arg1[%c0, %c0_0] : memref<8x32xf32, #tpu.memory_space<vmem>>, vector<8x32xf32>
    %c0_1 = arith.constant 0 : index
    %c0_2 = arith.constant 0 : index
    %1 = vector.load %arg2[%c0_1, %c0_2] : memref<32x16xf32, #tpu.memory_space<vmem>>, vector<32x16xf32>
    %cst = arith.constant dense<0.000000e+00> : vector<8x16xf32>
    %2 = tpu.matmul %0, %1, %cst {dimension_numbers = #tpu.dot_dimension_numbers<[1], [0], [0], [1], [0, 0, 1, 1], [], []>} : vector<8x32xf32>, vector<32x16xf32>, vector<8x16xf32> -> vector<8x16xf32>
    %c0_3 = arith.constant 0 : index
    %c0_4 = arith.constant 0 : index
    %3 = vector.load %arg3[%c0_3, %c0_4] : memref<1x16xf32, #tpu.memory_space<vmem>>, vector<1x16xf32>
    %4 = vector.broadcast %3 : vector<1x16xf32> to vector<8x16xf32>
    %5 = arith.addf %2, %4 : vector<8x16xf32>
    %c0_5 = arith.constant 0 : index
    %c0_6 = arith.constant 0 : index
    %6 = vector.load %arg4[%c0_5, %c0_6] : memref<8x16xf32, #tpu.memory_space<vmem>>, vector<8x16xf32>
    tpu.vector_store %arg4[%c0_5, %c0_6], %5 {strides = array<i32>} : memref<8x16xf32, #tpu.memory_space<vmem>>, vector<8x16xf32>,
    return
  }
  func.func @transform_0(%arg0: i32) -> (i32, i32) {
    %c0_i32 = arith.constant 0 : i32
    %c0_i32_0 = arith.constant 0 : i32
    return %arg0, %c0_i32 : i32, i32
  }
  func.func @transform_1(%arg0: i32) -> (i32, i32) {
    %c0_i32 = arith.constant 0 : i32
    %c0_i32_0 = arith.constant 0 : i32
    %c0_i32_1 = arith.constant 0 : i32
    return %c0_i32, %c0_i32_0 : i32, i32
  }
  func.func @transform_2(%arg0: i32) -> (i32, i32) {
    %c0_i32 = arith.constant 0 : i32
    %c0_i32_0 = arith.constant 0 : i32
    %c0_i32_1 = arith.constant 0 : i32
    return %c0_i32, %c0_i32_0 : i32, i32
  }
  func.func @transform_3(%arg0: i32) -> (i32, i32) {
    %c0_i32 = arith.constant 0 : i32
    %c0_i32_0 = arith.constant 0 : i32
    return %arg0, %c0_i32 : i32, i32
  }
}

</mosaic_0001>

<bundles_post_ra>
// kernel: linear_forward_pallas.1
= control target key start
LH: loop header
LB: loop body
LE: loop exit
PB: predicated region body
PF: predicated region fallthrough
CT: control target
= control target key end

     0   :  { %v169_v3 = vmov 0.0|0.0   ;;  %vm170_vm0 = vmmov 0   ;;  %v171_v6 = vmov 0.0   ;;  %s223_s0 = inlined_call_operand.vmem [shape: f32[8,32], index: 0, kind: input, shape index: {}]   ;;  %s224_s1 = inlined_call_operand.vmem [shape: f32[32,16], index: 1, kind: input, shape index: {}]   ;;  %s225_s2 = inlined_call_operand.vmem [shape: f32[1,16], index: 2, kind: input, shape index: {}]   ;;  %s226_s3 = inlined_call_operand.hbm [shape: f32[8,16], index: 3, kind: output, shape index: {}]  }
   0x1   :  { %v16_v0 = vld [vmem:[%s224_s1] sm:$0xff]  ;;  %v17_v1 = vld [vmem:[%s224_s1 + $0x8] sm:$0xff]  ;;  %v18_v2 = vld [vmem:[%s224_s1 + $0x10] sm:$0xff]  ;;  %135 = vmatprep.subr.bf16.mxu0 %v169_v3  ;;  %132 = vmatprep.mubr.msk.f32.mxu0 %vm170_vm0, %v171_v6 }
   0x2   :  { %v136_v4 = vpack.c.bf16 %v17_v1, %v16_v0  ;;  %v19_v5 = vld [vmem:[%s224_s1 + $0x18] sm:$0xff] }
   0x3   :  { %8 = vsyncpa [#allocation3], 0  ;;  %v139_v7 = vpack.c.bf16 %v19_v5, %v18_v2  ;;  %v15_v8 = vld [vmem:[%s223_s0] sm:$0xff]  ;;  %vm27_vm1 = vcmask 261120   ;;  %s172_s24 = smov [#allocation2]   ;;  %vm101_vm2 = vcmask 130048  }
   0x4   :  { %137 = vmatpush3.bf16.msra.mxu0 %v136_v4  ;;  %v117_v9 = vld [vmem:[%s225_s2] ss:$0 sm:$0xff]  ;;  %s109_s1 = sshll.u32 %s172_s24, 4  ;;  %s110_s1 = int_to_ptr.vmem [resolvable:$true] %s109_s1 }
   0x5   :  { %138 = vmatprep.subr.bf16.mxu0 %v169_v3  ;;  %s145_s25 = scalar_lea.vmem %s110_s1, 128  ;;  %p150_p1 = scmp.lt.s32.totalorder %s110_s1, %s110_s1 }
   0x6   :  { %p146_p0 = scmp.ne.s32.totalorder %s110_s1, %s145_s25  ;;  %p151_p2 = scmp.lt.s32.totalorder %s145_s25, %s145_s25 }
   0x8   :  { %140 = vmatpush3.bf16.msra.mxu0 %v139_v7  ;;  %p152_p3 = por %p151_p2, %p150_p1 }
   0xa   :  { %p153_p4 = pnand %p152_p3, %p146_p0 }
   0xb   :  { %133 = vmatmul.mubr.msk.f32.vlgmr.msra.gmra.mrb[0].mxu0 %vm27_vm1, %v15_v8 }
  0xde   :  { %v97_v10 = vpop.f32.mrb[0].mxu0 }
  0xdf   :  { %v98_v11 = vadd.f32 %v117_v9, %v97_v10  ;;  %v134_v12 = vpop.f32.mrb[1].mxu0 }
  0xe1   :  { %102 = vst.msk [vmem:[#allocation2] sm:$0xff] %vm101_vm2, %v98_v11 }
  0xe2   :  { %156 = shalt.err (!%p153_p4)
}
  0xe3   :  { %s157_s27 = scalar_lea.hbm %s226_s3, 128 }
  0xe4   :  { %p158_p5 = scmp.ne.s32.totalorder %s226_s3, %s157_s27  ;;  %p161_p6 = scmp.lt.u32.totalorder %s157_s27, %s226_s3 }
  0xe6   :  { %p163_p7 = pnand %p161_p6, %p158_p5 }
  0xe8   :  { %166 = shalt.err (!%p163_p7)
}
  0xe9   :  { %112 = dma.vmem_to_hbm [thread:$0]  %s110_s1, 128, %s226_s3, [#allocation3]  }
  0xea   :  { %167 = dma.done.wait [#allocation3], 128  }
  0xeb   :  { %168 = vsyncadd [#allocation3], 4294967168 }
  0xec   :  { %116 = vsyncpa [#allocation3], 1 }

</bundles_post_ra>
